<compile_context>
chip_gen: v5e
topology: v5e:2x2
jax: 0.10.0
libtpu: 0.0.40
codegen_flags: <defaults>
</compile_context>

<pallas_src>
import functools

import jax
import jax.numpy as jnp
from jax import lax
from jax.experimental import pallas as pl
from jax.experimental.pallas import tpu as pltpu


def am_softmax_kernel(feat_ref, wt_ref, finv_ref, winv_ref, labels_ref, loss_ref,
                      max_sc, sumexp_sc, sumlog_sc, lablog_sc,
                      *, margin, scale, eps, num_classes, tc):
    j = pl.program_id(1)                                  # class-tile index (innermost)

    @pl.when(j == 0)
    def _init():
        max_sc[...] = jnp.full_like(max_sc, -jnp.inf)
        sumexp_sc[...] = jnp.zeros_like(sumexp_sc)
        sumlog_sc[...] = jnp.zeros_like(sumlog_sc)
        lablog_sc[...] = jnp.zeros_like(lablog_sc)

    # bf16 MXU matmul with f32 accumulation; classes on lanes.  L2 normalization of
    # features / class rows is applied as a rank-1 rescale afterwards (mathematically
    # identical); both inverse norms are precomputed outside the kernel, so the body
    # has no per-step norm/cast work on the VALU/XLU.
    cos = jnp.dot(feat_ref[...], wt_ref[...],
                  preferred_element_type=jnp.float32)                      # (tb, tc)
    cos = jnp.clip(cos * (finv_ref[...] * winv_ref[...]), -1.0, 1.0)

    # Additive margin at the (global) label column of each row.
    labels = labels_ref[...]                                               # (tb, 1) i32
    col = j * tc + lax.broadcasted_iota(jnp.int32, cos.shape, 1)
    onehot = (col == labels).astype(jnp.float32)
    logits = scale * (cos - margin * onehot)                               # (tb, tc)

    # Online softmax / loss accumulators (per batch row).
    m_old = max_sc[...]
    m_new = jnp.maximum(m_old, jnp.max(logits, axis=1, keepdims=True))
    sumexp_sc[...] = (sumexp_sc[...] * jnp.exp(m_old - m_new)
                      + jnp.sum(jnp.exp(logits - m_new), axis=1, keepdims=True))
    max_sc[...] = m_new
    sumlog_sc[...] = sumlog_sc[...] + jnp.sum(logits, axis=1, keepdims=True)
    lablog_sc[...] = lablog_sc[...] + jnp.sum(logits * onehot, axis=1, keepdims=True)

    @pl.when(j == pl.num_programs(1) - 1)
    def _finalize():
        lse = max_sc[...] + jnp.log(sumexp_sc[...])
        # Label-smoothed CE without materializing the (b, C) targets matrix:
        #   loss_i = lse_i - (1-eps)*logits[i, y_i] - (eps/C)*sum_j logits[i, j]
        loss_ref[...] = (lse
                         - (1.0 - eps) * lablog_sc[...]
                         - (eps / num_classes) * sumlog_sc[...])


def am_softmax_v2_loss(features, labels, classifier_weight=None, *,
                       weight_t_bf16=None, weight_inv_norm=None,
                       m=0.35, s=30.0, epsilon=0.1, tb=512, tc=512,
                       vmem_limit_bytes=48 * 1024 * 1024):
    """AM-Softmax-v2 loss (matches the PyTorch module's forward).

    features          : (b, d) float
    labels            : (b,)   int
    classifier_weight : (C, d) float32 classifier rows (torch nn.Linear.weight)
    weight_t_bf16     : optional pre-prepared (d, C) bf16 copy of W^T.  Prepare it
                        ONCE (or store the parameter in that layout) so the
                        transpose/cast HBM traffic is not paid on every loss call.
    weight_inv_norm   : optional (1, C) float32 of 1/||W_row||_2 computed from f32 W.
    tb, tc            : batch / class tile sizes.  Production: tb=512, tc=512 on
                        v6e/v7x (tb~256 on v5e); keep b//tb >= 2 so both v7x cores
                        get batch tiles.  Clamped to the array sizes for small demos.
    """
    b, d = features.shape
    if weight_t_bf16 is None:
        assert classifier_weight is not None
        # TODO(synk): in production keep the classifier stored as (d, C) bf16 (plus its
        # f32 row inverse norms) so this transpose/cast is not re-paid per invocation.
        weight_t_bf16 = classifier_weight.T.astype(jnp.bfloat16)
    if weight_inv_norm is None:
        assert classifier_weight is not None
        weight_inv_norm = (1.0 / jnp.linalg.norm(
            classifier_weight.astype(jnp.float32), axis=1)).reshape(1, -1)
    d2, C = weight_t_bf16.shape
    assert d == d2, "weight must be (num_classes, d) / (d, num_classes) transposed"
    weight_inv_norm = weight_inv_norm.reshape(1, C).astype(jnp.float32)

    tb = min(tb, b)
    tc = min(tc, C)
    # TODO(synk): pad B / C (masking padded class columns to -inf for max/lse and 0
    # for the sum-logit / label-logit terms) when shapes are not tile-aligned.
    assert b % tb == 0 and C % tc == 0

    # Per-row feature inverse norm (F.normalize, eps=1e-12) computed once, in f32;
    # features are handed to the MXU as bf16 (halves feature HBM/VMEM traffic).
    f32 = features.astype(jnp.float32)
    f_inv = lax.rsqrt(jnp.maximum(jnp.sum(f32 * f32, axis=1, keepdims=True), 1e-24))
    feat_bf16 = features.astype(jnp.bfloat16)
    labels2d = labels.reshape(b, 1).astype(jnp.int32)

    kern = functools.partial(am_softmax_kernel, margin=float(m), scale=float(s),
                             eps=float(epsilon), num_classes=C, tc=tc)

    per_row = pl.pallas_call(
        kern,
        out_shape=jax.ShapeDtypeStruct((b, 1), jnp.float32),
        grid_spec=pltpu.PrefetchScalarGridSpec(
            num_scalar_prefetch=0,
            grid=(b // tb, C // tc),                           # class axis innermost
            in_specs=[
                pl.BlockSpec((tb, d), lambda i, j: (i, 0)),    # features (bf16)
                pl.BlockSpec((d, tc), lambda i, j: (0, j)),    # W^T tile (bf16)
                pl.BlockSpec((tb, 1), lambda i, j: (i, 0)),    # 1/||f_i||   (f32)
                pl.BlockSpec((1, tc), lambda i, j: (0, j)),    # 1/||W_c||   (f32)
                pl.BlockSpec((tb, 1), lambda i, j: (i, 0)),    # labels     (int32)
            ],
            out_specs=pl.BlockSpec((tb, 1), lambda i, j: (i, 0)),
            scratch_shapes=[pltpu.VMEM((tb, 1), jnp.float32)] * 4,
        ),
        compiler_params=pltpu.CompilerParams(
            dimension_semantics=("parallel", "arbitrary"),
            vmem_limit_bytes=vmem_limit_bytes),
    )(feat_bf16, weight_t_bf16, f_inv, weight_inv_norm, labels2d)

    # (-targets * log_probs).mean(0).sum()  ==  mean over batch of per-row loss.
    return jnp.mean(per_row)


def _reference_loss(features, labels, w, m, s, eps):
    f = features / jnp.maximum(
        jnp.linalg.norm(features, axis=1, keepdims=True), 1e-12)
    wn = w / jnp.linalg.norm(w, axis=1, keepdims=True)
    cos = jnp.clip(f @ wn.T, -1.0, 1.0)
    onehot = jax.nn.one_hot(labels, w.shape[0], dtype=jnp.float32)
    logits = s * (cos - m * onehot)
    logp = jax.nn.log_softmax(logits, axis=1)
    targets = (1.0 - eps) * onehot + eps / w.shape[0]
    return jnp.sum(jnp.mean(-targets * logp, axis=0))


if __name__ == "__main__":
    # Small, tile-aligned demo shapes.  (Production: d=2048, C padded to a multiple
    # of tc, tb=512 / tc=512 on v6e/v7x, tb~256 on v5e.)
    B, D, NUM_CLASSES = 32, 256, 512
    M, S, EPS = 0.35, 30.0, 0.1

    key = jax.random.PRNGKey(0)
    k_feat, k_w, k_lab = jax.random.split(key, 3)
    features = jax.random.normal(k_feat, (B, D), dtype=jnp.float32)
    classifier_weight = jax.random.normal(k_w, (NUM_CLASSES, D), dtype=jnp.float32) * 0.05
    labels = jax.random.randint(k_lab, (B,), 0, NUM_CLASSES, dtype=jnp.int32)

    # Prepare the class-on-lanes bf16 weight copy and f32 row inverse norms ONCE
    # (in a real trainer this lives with the parameter, not inside the loss call).
    w_t_bf16 = classifier_weight.T.astype(jnp.bfloat16)
    w_inv = (1.0 / jnp.linalg.norm(classifier_weight, axis=1)).reshape(1, NUM_CLASSES)

    # Small tiles for the demo so the grid exercises both batch-parallel tiles and
    # the online-softmax accumulation across class tiles (grid = (2, 2)).
    loss = am_softmax_v2_loss(features, labels,
                              weight_t_bf16=w_t_bf16, weight_inv_norm=w_inv,
                              m=M, s=S, epsilon=EPS, tb=16, tc=256)
    loss = jax.block_until_ready(loss)

    ref = jax.block_until_ready(
        _reference_loss(features, labels, classifier_weight, M, S, EPS))

    assert loss.shape == () and bool(jnp.isfinite(loss))
    # bf16 MXU cosines differ from the f32 reference by ~1e-3 (~0.03 in logits at s=30).
    assert abs(float(loss) - float(ref)) <= 0.5 + 0.05 * abs(float(ref)), (loss, ref)
    print("KERNEL_OK")
</pallas_src>

<mosaic_0001>
module attributes {stable_mosaic.version = 11 : i64} {
  func.func @am_softmax_kernel(%arg0: i32, %arg1: i32, %arg2: memref<16x256xbf16, #tpu.memory_space<vmem>>, %arg3: memref<256x256xbf16, #tpu.memory_space<vmem>>, %arg4: memref<16x1xf32, #tpu.memory_space<vmem>>, %arg5: memref<1x256xf32, #tpu.memory_space<vmem>>, %arg6: memref<16x1xi32, #tpu.memory_space<vmem>>, %arg7: memref<16x1xf32, #tpu.memory_space<vmem>>, %arg8: memref<16x1xf32, #tpu.memory_space<vmem>>, %arg9: memref<16x1xf32, #tpu.memory_space<vmem>>, %arg10: memref<16x1xf32, #tpu.memory_space<vmem>>, %arg11: memref<16x1xf32, #tpu.memory_space<vmem>>) attributes {dimension_semantics = [#tpu.dimension_semantics<parallel>, #tpu.dimension_semantics<arbitrary>], iteration_bounds = array<i64: 2, 2>, scalar_prefetch = 0 : i64, scratch_operands = 4 : i64, tpu.core_type = #tpu.core_type<tc>, window_params = [{transform_indices = @transform_0, window_bounds = array<i64: 16, 256>}, {transform_indices = @transform_1, window_bounds = array<i64: 256, 256>}, {transform_indices = @transform_2, window_bounds = array<i64: 16, 1>}, {transform_indices = @transform_3, window_bounds = array<i64: 1, 256>}, {transform_indices = @transform_4, window_bounds = array<i64: 16, 1>}, {transform_indices = @transform_5, window_bounds = array<i64: 16, 1>}]} {
    %c0_i32 = arith.constant 0 : i32
    %0 = arith.cmpi eq, %arg1, %c0_i32 : i32
    %1 = arith.extui %0 : i1 to i32
    %c0_i32_0 = arith.constant 0 : i32
    %2 = arith.cmpi ne, %1, %c0_i32_0 : i32
    scf.if %2 {
      %cst_35 = arith.constant 0xFF800000 : f32
      %60 = vector.broadcast %cst_35 : f32 to vector<16x1xf32>
      %c0_36 = arith.constant 0 : index
      %c0_37 = arith.constant 0 : index
      %61 = vector.load %arg8[%c0_36, %c0_37] : memref<16x1xf32, #tpu.memory_space<vmem>>, vector<16x1xf32>
      tpu.vector_store %arg8[%c0_36, %c0_37], %60 {strides = array<i32>} : memref<16x1xf32, #tpu.memory_space<vmem>>, vector<16x1xf32>,
      %cst_38 = arith.constant 0.000000e+00 : f32
      %62 = vector.broadcast %cst_38 : f32 to vector<16x1xf32>
      %c0_39 = arith.constant 0 : index
      %c0_40 = arith.constant 0 : index
      %63 = vector.load %arg9[%c0_39, %c0_40] : memref<16x1xf32, #tpu.memory_space<vmem>>, vector<16x1xf32>
      tpu.vector_store %arg9[%c0_39, %c0_40], %62 {strides = array<i32>} : memref<16x1xf32, #tpu.memory_space<vmem>>, vector<16x1xf32>,
      %cst_41 = arith.constant 0.000000e+00 : f32
      %64 = vector.broadcast %cst_41 : f32 to vector<16x1xf32>
      %c0_42 = arith.constant 0 : index
      %c0_43 = arith.constant 0 : index
      %65 = vector.load %arg10[%c0_42, %c0_43] : memref<16x1xf32, #tpu.memory_space<vmem>>, vector<16x1xf32>
      tpu.vector_store %arg10[%c0_42, %c0_43], %64 {strides = array<i32>} : memref<16x1xf32, #tpu.memory_space<vmem>>, vector<16x1xf32>,
      %cst_44 = arith.constant 0.000000e+00 : f32
      %66 = vector.broadcast %cst_44 : f32 to vector<16x1xf32>
      %c0_45 = arith.constant 0 : index
      %c0_46 = arith.constant 0 : index
      %67 = vector.load %arg11[%c0_45, %c0_46] : memref<16x1xf32, #tpu.memory_space<vmem>>, vector<16x1xf32>
      tpu.vector_store %arg11[%c0_45, %c0_46], %66 {strides = array<i32>} : memref<16x1xf32, #tpu.memory_space<vmem>>, vector<16x1xf32>,
    } else {
    }
    %c0 = arith.constant 0 : index
    %c0_1 = arith.constant 0 : index
    %3 = vector.load %arg2[%c0, %c0_1] : memref<16x256xbf16, #tpu.memory_space<vmem>>, vector<16x256xbf16>
    %c0_2 = arith.constant 0 : index
    %c0_3 = arith.constant 0 : index
    %4 = vector.load %arg3[%c0_2, %c0_3] : memref<256x256xbf16, #tpu.memory_space<vmem>>, vector<256x256xbf16>
    %cst = arith.constant dense<0.000000e+00> : vector<16x256xf32>
    %5 = tpu.matmul %3, %4, %cst {dimension_numbers = #tpu.dot_dimension_numbers<[1], [0], [0], [1], [0, 0, 1, 1], [], []>} : vector<16x256xbf16>, vector<256x256xbf16>, vector<16x256xf32> -> vector<16x256xf32>
    %c0_4 = arith.constant 0 : index
    %c0_5 = arith.constant 0 : index
    %6 = vector.load %arg4[%c0_4, %c0_5] : memref<16x1xf32, #tpu.memory_space<vmem>>, vector<16x1xf32>
    %c0_6 = arith.constant 0 : index
    %c0_7 = arith.constant 0 : index
    %7 = vector.load %arg5[%c0_6, %c0_7] : memref<1x256xf32, #tpu.memory_space<vmem>>, vector<1x256xf32>
    %8 = vector.broadcast %6 : vector<16x1xf32> to vector<16x256xf32>
    %9 = vector.broadcast %7 : vector<1x256xf32> to vector<16x256xf32>
    %10 = arith.mulf %8, %9 : vector<16x256xf32>
    %11 = arith.mulf %5, %10 : vector<16x256xf32>
    %cst_8 = arith.constant -1.000000e+00 : f32
    %cst_9 = arith.constant 1.000000e+00 : f32
    %12 = vector.broadcast %cst_8 : f32 to vector<16x256xf32>
    %13 = arith.maximumf %12, %11 : vector<16x256xf32>
    %14 = vector.broadcast %cst_9 : f32 to vector<16x256xf32>
    %15 = arith.minimumf %14, %13 : vector<16x256xf32>
    %c0_10 = arith.constant 0 : index
    %c0_11 = arith.constant 0 : index
    %16 = vector.load %arg6[%c0_10, %c0_11] : memref<16x1xi32, #tpu.memory_space<vmem>>, vector<16x1xi32>
    %c256_i32 = arith.constant 256 : i32
    %17 = arith.muli %arg1, %c256_i32 : i32
    %18 = tpu.iota {dimensions = array<i32: 1>} : vector<16x256xi32>
    %19 = vector.broadcast %17 : i32 to vector<16x256xi32>
    %20 = arith.addi %19, %18 : vector<16x256xi32>
    %21 = vector.broadcast %16 : vector<16x1xi32> to vector<16x256xi32>
    %22 = arith.cmpi eq, %20, %21 : vector<16x256xi32>
    %23 = arith.extui %22 : vector<16x256xi1> to vector<16x256xi32>
    %24 = arith.sitofp %23 : vector<16x256xi32> to vector<16x256xf32>
    %cst_12 = arith.constant 3.500000e-01 : f32
    %25 = vector.broadcast %cst_12 : f32 to vector<16x256xf32>
    %26 = arith.mulf %25, %24 : vector<16x256xf32>
    %27 = arith.subf %15, %26 : vector<16x256xf32>
    %cst_13 = arith.constant 3.000000e+01 : f32
    %28 = vector.broadcast %cst_13 : f32 to vector<16x256xf32>
    %29 = arith.mulf %28, %27 : vector<16x256xf32>
    %c0_14 = arith.constant 0 : index
    %c0_15 = arith.constant 0 : index
    %30 = vector.load %arg8[%c0_14, %c0_15] : memref<16x1xf32, #tpu.memory_space<vmem>>, vector<16x1xf32>
    %cst_16 = arith.constant dense<0xFF800000> : vector<16xf32>
    %31 = vector.multi_reduction <maximumf>, %29, %cst_16 [1] : vector<16x256xf32> to vector<16xf32>
    %32 = vector.shape_cast %31 : vector<16xf32> to vector<16x1xf32>
    %33 = arith.maximumf %30, %32 : vector<16x1xf32>
    %c0_17 = arith.constant 0 : index
    %c0_18 = arith.constant 0 : index
    %34 = vector.load %arg9[%c0_17, %c0_18] : memref<16x1xf32, #tpu.memory_space<vmem>>, vector<16x1xf32>
    %35 = arith.subf %30, %33 : vector<16x1xf32>
    %36 = math.exp %35 : vector<16x1xf32>
    %37 = arith.mulf %34, %36 : vector<16x1xf32>
    %38 = vector.broadcast %33 : vector<16x1xf32> to vector<16x256xf32>
    %39 = arith.subf %29, %38 : vector<16x256xf32>
    %40 = math.exp %39 : vector<16x256xf32>
    %cst_19 = arith.constant dense<0.000000e+00> : vector<16xf32>
    %41 = vector.multi_reduction <add>, %40, %cst_19 [1] : vector<16x256xf32> to vector<16xf32>
    %42 = vector.shape_cast %41 : vector<16xf32> to vector<16x1xf32>
    %43 = arith.addf %37, %42 : vector<16x1xf32>
    %c0_20 = arith.constant 0 : index
    %c0_21 = arith.constant 0 : index
    %44 = vector.load %arg9[%c0_20, %c0_21] : memref<16x1xf32, #tpu.memory_space<vmem>>, vector<16x1xf32>
    tpu.vector_store %arg9[%c0_20, %c0_21], %43 {strides = array<i32>} : memref<16x1xf32, #tpu.memory_space<vmem>>, vector<16x1xf32>,
    %c0_22 = arith.constant 0 : index
    %c0_23 = arith.constant 0 : index
    %45 = vector.load %arg8[%c0_22, %c0_23] : memref<16x1xf32, #tpu.memory_space<vmem>>, vector<16x1xf32>
    tpu.vector_store %arg8[%c0_22, %c0_23], %33 {strides = array<i32>} : memref<16x1xf32, #tpu.memory_space<vmem>>, vector<16x1xf32>,
    %c0_24 = arith.constant 0 : index
    %c0_25 = arith.constant 0 : index
    %46 = vector.load %arg10[%c0_24, %c0_25] : memref<16x1xf32, #tpu.memory_space<vmem>>, vector<16x1xf32>
    %cst_26 = arith.constant dense<0.000000e+00> : vector<16xf32>
    %47 = vector.multi_reduction <add>, %29, %cst_26 [1] : vector<16x256xf32> to vector<16xf32>
    %48 = vector.shape_cast %47 : vector<16xf32> to vector<16x1xf32>
    %49 = arith.addf %46, %48 : vector<16x1xf32>
    %c0_27 = arith.constant 0 : index
    %c0_28 = arith.constant 0 : index
    %50 = vector.load %arg10[%c0_27, %c0_28] : memref<16x1xf32, #tpu.memory_space<vmem>>, vector<16x1xf32>
    tpu.vector_store %arg10[%c0_27, %c0_28], %49 {strides = array<i32>} : memref<16x1xf32, #tpu.memory_space<vmem>>, vector<16x1xf32>,
    %c0_29 = arith.constant 0 : index
    %c0_30 = arith.constant 0 : index
    %51 = vector.load %arg11[%c0_29, %c0_30] : memref<16x1xf32, #tpu.memory_space<vmem>>, vector<16x1xf32>
    %52 = arith.mulf %29, %24 : vector<16x256xf32>
    %cst_31 = arith.constant dense<0.000000e+00> : vector<16xf32>
    %53 = vector.multi_reduction <add>, %52, %cst_31 [1] : vector<16x256xf32> to vector<16xf32>
    %54 = vector.shape_cast %53 : vector<16xf32> to vector<16x1xf32>
    %55 = arith.addf %51, %54 : vector<16x1xf32>
    %c0_32 = arith.constant 0 : index
    %c0_33 = arith.constant 0 : index
    %56 = vector.load %arg11[%c0_32, %c0_33] : memref<16x1xf32, #tpu.memory_space<vmem>>, vector<16x1xf32>
    tpu.vector_store %arg11[%c0_32, %c0_33], %55 {strides = array<i32>} : memref<16x1xf32, #tpu.memory_space<vmem>>, vector<16x1xf32>,
    %c1_i32 = arith.constant 1 : i32
    %57 = arith.cmpi eq, %arg1, %c1_i32 : i32
    %58 = arith.extui %57 : i1 to i32
    %c0_i32_34 = arith.constant 0 : i32
    %59 = arith.cmpi ne, %58, %c0_i32_34 : i32
    scf.if %59 {
      %c0_35 = arith.constant 0 : index
      %c0_36 = arith.constant 0 : index
      %60 = vector.load %arg8[%c0_35, %c0_36] : memref<16x1xf32, #tpu.memory_space<vmem>>, vector<16x1xf32>
      %c0_37 = arith.constant 0 : index
      %c0_38 = arith.constant 0 : index
      %61 = vector.load %arg9[%c0_37, %c0_38] : memref<16x1xf32, #tpu.memory_space<vmem>>, vector<16x1xf32>
      %62 = math.log %61 : vector<16x1xf32>
      %63 = arith.addf %60, %62 : vector<16x1xf32>
      %c0_39 = arith.constant 0 : index
      %c0_40 = arith.constant 0 : index
      %64 = vector.load %arg11[%c0_39, %c0_40] : memref<16x1xf32, #tpu.memory_space<vmem>>, vector<16x1xf32>
      %cst_41 = arith.constant 0.899999976 : f32
      %65 = vector.broadcast %cst_41 : f32 to vector<16x1xf32>
      %66 = arith.mulf %65, %64 : vector<16x1xf32>
      %67 = arith.subf %63, %66 : vector<16x1xf32>
      %c0_42 = arith.constant 0 : index
      %c0_43 = arith.constant 0 : index
      %68 = vector.load %arg10[%c0_42, %c0_43] : memref<16x1xf32, #tpu.memory_space<vmem>>, vector<16x1xf32>
      %cst_44 = arith.constant 1.95312503E-4 : f32
      %69 = vector.broadcast %cst_44 : f32 to vector<16x1xf32>
      %70 = arith.mulf %69, %68 : vector<16x1xf32>
      %71 = arith.subf %67, %70 : vector<16x1xf32>
      %c0_45 = arith.constant 0 : index
      %c0_46 = arith.constant 0 : index
      %72 = vector.load %arg7[%c0_45, %c0_46] : memref<16x1xf32, #tpu.memory_space<vmem>>, vector<16x1xf32>
      tpu.vector_store %arg7[%c0_45, %c0_46], %71 {strides = array<i32>} : memref<16x1xf32, #tpu.memory_space<vmem>>, vector<16x1xf32>,
    } else {
    }
    return
  }
  func.func @transform_0(%arg0: i32, %arg1: i32) -> (i32, i32) {
    %c0_i32 = arith.constant 0 : i32
    %c0_i32_0 = arith.constant 0 : i32
    return %arg0, %c0_i32 : i32, i32
  }
  func.func @transform_1(%arg0: i32, %arg1: i32) -> (i32, i32) {
    %c0_i32 = arith.constant 0 : i32
    %c0_i32_0 = arith.constant 0 : i32
    return %c0_i32, %arg1 : i32, i32
  }
  func.func @transform_2(%arg0: i32, %arg1: i32) -> (i32, i32) {
    %c0_i32 = arith.constant 0 : i32
    %c0_i32_0 = arith.constant 0 : i32
    return %arg0, %c0_i32 : i32, i32
  }
  func.func @transform_3(%arg0: i32, %arg1: i32) -> (i32, i32) {
    %c0_i32 = arith.constant 0 : i32
    %c0_i32_0 = arith.constant 0 : i32
    return %c0_i32, %arg1 : i32, i32
  }
  func.func @transform_4(%arg0: i32, %arg1: i32) -> (i32, i32) {
    %c0_i32 = arith.constant 0 : i32
    %c0_i32_0 = arith.constant 0 : i32
    return %arg0, %c0_i32 : i32, i32
  }
  func.func @transform_5(%arg0: i32, %arg1: i32) -> (i32, i32) {
    %c0_i32 = arith.constant 0 : i32
    %c0_i32_0 = arith.constant 0 : i32
    return %arg0, %c0_i32 : i32, i32
  }
}

</mosaic_0001>

<bundles_post_ra>
// kernel: tpu_custom_call.1
= control target key start
LH: loop header
LB: loop body
LE: loop exit
PB: predicated region body
PF: predicated region fallthrough
CT: control target
= control target key end

     0   :  { %s1590_s0 = inlined_call_operand.vmem [shape: bf16[32,256], index: 0, kind: input, shape index: {}]   ;;  %s1591_s1 = inlined_call_operand.hbm [shape: bf16[256,512], index: 1, kind: input, shape index: {}]   ;;  %s1592_s2 = inlined_call_operand.vmem [shape: f32[32,1], index: 2, kind: input, shape index: {}]   ;;  %s1593_s3 = inlined_call_operand.vmem [shape: f32[1,512], index: 3, kind: input, shape index: {}]   ;;  %s1594_s4 = inlined_call_operand.vmem [shape: s32[32,1], index: 4, kind: input, shape index: {}]   ;;  %s1595_s5 = inlined_call_operand.vmem [shape: f32[32,1], index: 5, kind: output, shape index: {}]  }
   0x1   :  { %1596 = sst [smem:[#allocation9_spill]] %s1591_s1 }
   0x2   :  { %10 = vsyncpa [#allocation7], 0 }
   0x3   :  { %12 = vsyncpa [#allocation7 + $0x1], 0  ;;  %s1365_s18 = smov 0   ;;  %s1367_s19 = smov 0  }
   0x4   :  { %s1369_s20 = smov 0   ;;  %s1371_s21 = smov 0  }
   0x5   :  { %s1373_s22 = smov 0   ;;  %s1375_s23 = smov 0  }
   0x6   :  { %s1377_s24 = smov 0   ;;  %s1379_s25 = smov 0  }
   0x7 LB: > { %s930_s26 = sadd.s32 4294967295, %s1326_s25   ;;  %s27_s27 = sadd.s32 1, %s1318_s23  ;;  %s1326_s25 = sphi %s1379_s25, %s18_s25   ;;  %s1322_s24 = sphi %s1377_s24, %s1606_s24   ;;  %s1318_s23 = sphi %s1375_s23, %s1605_s23   ;;  %s1314_s22 = sphi %s1373_s22, %s1604_s22   ;;  %s1310_s21 = sphi %s1371_s21, %s1603_s21   ;;  %s1306_s20 = sphi %s1369_s20, %s1602_s20   ;;  %s1302_s19 = sphi %s1367_s19, %s1601_s19   ;;  %s1298_s18 = sphi %s1365_s18, %s1600_s18  }
   0x8   : > { %p28_p0 = scmp.ge.s32.totalorder %s27_s27, 2  ;;  %s30_s28 = sadd.s32 1, %s1322_s24 }
   0x9   : > { %s63_s29 = sadd.s32 1, %s1306_s20  ;;  %p70_p1 = scmp.ne.s32.totalorder %s1306_s20, %s1302_s19 }
   0xa   : > { %s1608_s27 = smov (%p28_p0, %s27_s27), 0  ;;  %s1610_s28 = smov (!%p28_p0, %s30_s28), %s1322_s24 }
   0xb   : > { %s60_s30 = ssub.s32 %s1318_s23, %s1608_s27  ;;  %p71_p2 = scmp.eq.s32.totalorder %s1326_s25, 0 }
   0xc   : > { %p32_p3 = scmp.ge.s32.totalorder %s1610_s28, 2  ;;  %p61_p4 = scmp.eq.s32.totalorder %s60_s30, 0 }
   0xd   : > { %p1415_p5 = por %p71_p2, %p70_p1  ;;  %p76_p6 = scmp.ne.s32.totalorder %s1302_s19, %s1298_s18 }
   0xe   : > { %s1612_s28 = smov (%p32_p3, %s1610_s28), 0  ;;  %p77_p7 = scmp.eq.s32.totalorder %s930_s26, 0 }
   0xf   : > { %s1423_s7 = scalar_select %p61_p4, %s1306_s20, %s63_s29  }
  0x10   : > { %p1140_p8 = scmp.lt.s32.totalorder %s1326_s25, 4  ;;  %s214_s8 = sand.u32 1, %s1306_s20  }
  0x11   : > { %p1427_p9 = por %p77_p7, %p76_p6  ;;  %s934_s10 = sshll.u32 %s214_s8, 8 }
  0x12   : > { %s1098_s11 = sshll.u32 %s1318_s23, 3  ;;  %s1599_s1 = sld [smem:[#allocation9_spill]] }
  0x13   : > { %s218_s16 = scalar_lea.vmem [#allocation6], %s934_s10  ;;  %p1137_p10 = pnand %p1140_p8, %p1415_p5 }
  0x14   : > { %s226_s17 = sshll.u32 %s218_s16, 4  ;;  %p937_p11 = scmp.ge.s32.totalorder %s1326_s25, 1  ;;  %s227_s17 = int_to_ptr.vmem [resolvable:$true] %s226_s17 }
  0x15   : > { %s215_s18 = scalar_lea.sflag [#allocation7], %s214_s8  ;;  %s1328_s26 = smov 256  }
  0x16   : > { %s1329_s29 = smov 128   ;;  %s1330_s30 = smov 8  }
  0x17   : > { %p260_p12 = scmp.lt.s32.totalorder %s1326_s25, 5 }
  0x18   : > { %s223_s14 = scalar_lea.hbm %s1599_s1, %s1098_s11 }
  0x19   : > { %s224_s15 = sshll.u32 %s223_s14, 4  ;;  %p261_p13 = pnand %p937_p11, %p260_p12  ;;  %s225_s15 = int_to_ptr.hbm [resolvable:$true] %s224_s15 }
  0x1a   : > { %1139 = dma.hbm_to_vmem [thread:$0]  (!%p1137_p10), %s225_s15, 4096, %s227_s17, %s215_s18, %s1328_s26, %s1329_s29, %s1330_s30  }
  0x1b   : > { %264 = sbr.rel (%p261_p13) target bundleno = 642 (0x282), region = 40  ;;  %s266_s12 = sand.u32 (!%p261_p13), 1, %s1302_s19  }
  0x1c   : > { %s938_s11 = sshll.u32 (!%p261_p13), %s266_s12, 8  ;;  %s267_s13 = scalar_lea.sflag (!%p261_p13), [#allocation7], %s266_s12 }
  0x1d   : > { %s1440_s10 = scalar_lea.vmem (!%p261_p13), [#allocation6], %s938_s11 }
  0x20   : > { %1293 = dma.done.wait (%p1427_p9), %s267_s13, 4096  }
  0x21   : > { %1295 = vsyncadd (%p1427_p9), %s267_s13, 4294963200  ;;  %s939_s6 = sshll.u32 %s1314_s22, 1  ;;  %s944_s8 = sshll.u32 %s1310_s21, 1 }
  0x22   : > { %p319_p0 = scmp.lt.s32.totalorder %s939_s6, 3  ;;  %p333_p1 = scmp.lt.s32.totalorder %s944_s8, 3 }
  0x23   : > { %p949_p2 = scmp.ne.s32.totalorder %s1310_s21, 0 }
  0x24   : > { %s1614_s6 = smov (!%p319_p0, %s939_s6), 3  ;;  %s1616_s8 = smov (!%p333_p1, %s944_s8), 3 }
  0x25   : > { %s1099_s14 = sshll.u32 %s1614_s6, 3  ;;  %s335_s30 = scalar_lea.vmem %s1593_s3, %s1616_s8 }
  0x26   : > { %s1453_s17 = scalar_lea.vmem %s1590_s0, %s1099_s14  ;;  %s1458_s9 = scalar_lea.vmem %s1592_s2, %s1099_s14 }
  0x27   : > { %s1467_s13 = scalar_lea.vmem %s1594_s4, %s1099_s14  ;;  %s1472_s15 = scalar_lea.vmem %s1595_s5, %s1099_s14 }
  0x28   : > { %352 = sbr.rel (%p949_p2) target bundleno = 54 (0x36), region = 48 }
  0x2d   : > { %vm353_vm0 = vcmask 7168   ;;  %v1331_v0 = vmov -inf   ;;  %v1332_v1 = vmov 0.0  }
  0x2e   : > { %354 = vst.msk [vmem:[#allocation2] sm:$0xff] %vm353_vm0, %v1331_v0 }
  0x2f   : > { %355 = vst.msk [vmem:[#allocation2 + $0x8] sm:$0xff] %vm353_vm0, %v1331_v0 }
  0x30   : > { %356 = vst.msk [vmem:[#allocation3] sm:$0xff] %vm353_vm0, %v1332_v1 }
  0x31   : > { %357 = vst.msk [vmem:[#allocation3 + $0x8] sm:$0xff] %vm353_vm0, %v1332_v1 }
  0x32   : > { %358 = vst.msk [vmem:[#allocation4] sm:$0xff] %vm353_vm0, %v1332_v1 }
  0x33   : > { %359 = vst.msk [vmem:[#allocation4 + $0x8] sm:$0xff] %vm353_vm0, %v1332_v1 }
  0x34   : > { %360 = vst.msk [vmem:[#allocation5] sm:$0xff] %vm353_vm0, %v1332_v1 }
  0x35   : > { %361 = vst.msk [vmem:[#allocation5 + $0x8] sm:$0xff] %vm353_vm0, %v1332_v1 }
  0x36 PF: > { %v1016_v2 = vld [vmem:[%s1440_s10 + $0x70] sm:$0xf]  ;;  %v1117_v3 = vld [vmem:[%s1440_s10 + $0x74] sm:$0xf0]  ;;  %v1116_v7 = vld [vmem:[%s1440_s10 + $0x74] sm:$0xf] }
  0x37   : > { %v1080_v4 = vld [vmem:[%s1440_s10 + $0xf0] sm:$0xf]  ;;  %v1017_v5 = vor.u32 %v1117_v3, %v1016_v2  ;;  %v1133_v6 = vld [vmem:[%s1440_s10 + $0xf4] sm:$0xf0]  ;;  %v1018_v8 = vld [vmem:[%s1440_s10 + $0x78] sm:$0xf0] }
  0x38   : > { %v1081_v9 = vor.u32 %v1133_v6, %v1080_v4  ;;  %v1021_v10 = vor.u32 %v1116_v7, %v1018_v8  ;;  %v1132_v11 = vld [vmem:[%s1440_s10 + $0xf4] sm:$0xf]  ;;  %v1082_v12 = vld [vmem:[%s1440_s10 + $0xf8] sm:$0xf0]  ;;  %v1008_v13 = vld [vmem:[%s1440_s10 + $0x60] sm:$0xf] }
  0x39   : > { %566 = vmatpush.bf16.msra.mxu0 %v1017_v5  ;;  %v1085_v14 = vor.u32 %v1132_v11, %v1082_v12  ;;  %v1115_v15 = vld [vmem:[%s1440_s10 + $0x64] sm:$0xf0]  ;;  %v1072_v16 = vld [vmem:[%s1440_s10 + $0xe0] sm:$0xf]  ;;  %v1114_v20 = vld [vmem:[%s1440_s10 + $0x64] sm:$0xf] }
  0x3a   : > { %v1131_v17 = vld [vmem:[%s1440_s10 + $0xe4] sm:$0xf0]  ;;  %580 = vmatpush.bf16.msra.mxu1 %v1081_v9  ;;  %594 = vmatpush.bf16.msra.mxu2 %v1021_v10  ;;  %v1009_v18 = vor.u32 %v1115_v15, %v1008_v13  ;;  %v1010_v21 = vld [vmem:[%s1440_s10 + $0x68] sm:$0xf0]  ;;  %v1130_v22 = vld [vmem:[%s1440_s10 + $0xe4] sm:$0xf] }
  0x3b   : > { %v1073_v19 = vor.u32 %v1131_v17, %v1072_v16  ;;  %608 = vmatpush.bf16.msra.mxu3 %v1085_v14  ;;  %v1013_v23 = vor.u32 %v1114_v20, %v1010_v21  ;;  %v1074_v24 = vld [vmem:[%s1440_s10 + $0xe8] sm:$0xf0]  ;;  %v1000_v25 = vld [vmem:[%s1440_s10 + $0x50] sm:$0xf]  ;;  %v1113_v26 = vld [vmem:[%s1440_s10 + $0x54] sm:$0xf0] }
  0x3c   : > { %v1077_v27 = vor.u32 %v1130_v22, %v1074_v24  ;;  %v1064_v28 = vld [vmem:[%s1440_s10 + $0xd0] sm:$0xf]  ;;  %v1129_v29 = vld [vmem:[%s1440_s10 + $0xd4] sm:$0xf0]  ;;  %v1112_v30 = vld [vmem:[%s1440_s10 + $0x54] sm:$0xf]  ;;  %v1001_v31 = vor.u32 %v1113_v26, %v1000_v25 }
  0x3d   : > { %567 = vmatpush.bf16.msra.mxu0 %v1009_v18  ;;  %v1002_v32 = vld [vmem:[%s1440_s10 + $0x58] sm:$0xf0]  ;;  %v1128_v33 = vld [vmem:[%s1440_s10 + $0xd4] sm:$0xf]  ;;  %v1065_v35 = vor.u32 %v1129_v29, %v1064_v28  ;;  %v992_v37 = vld [vmem:[%s1440_s10 + $0x40] sm:$0xf] }
  0x3e   : > { %v1066_v34 = vld [vmem:[%s1440_s10 + $0xd8] sm:$0xf0]  ;;  %581 = vmatpush.bf16.msra.mxu1 %v1073_v19  ;;  %595 = vmatpush.bf16.msra.mxu2 %v1013_v23  ;;  %v1005_v36 = vor.u32 %v1112_v30, %v1002_v32  ;;  %v1111_v38 = vld [vmem:[%s1440_s10 + $0x44] sm:$0xf0]  ;;  %v1056_v39 = vld [vmem:[%s1440_s10 + $0xc0] sm:$0xf] }
  0x3f   : > { %609 = vmatpush.bf16.msra.mxu3 %v1077_v27  ;;  %v1069_v40 = vor.u32 %v1128_v33, %v1066_v34  ;;  %v1127_v41 = vld [vmem:[%s1440_s10 + $0xc4] sm:$0xf0]  ;;  %v1110_v42 = vld [vmem:[%s1440_s10 + $0x44] sm:$0xf]  ;;  %v994_v43 = vld [vmem:[%s1440_s10 + $0x48] sm:$0xf0]  ;;  %v993_v46 = vor.u32 %v1111_v38, %v992_v37 }
  0x40   : > { %v1126_v44 = vld [vmem:[%s1440_s10 + $0xc4] sm:$0xf]  ;;  %v1058_v45 = vld [vmem:[%s1440_s10 + $0xc8] sm:$0xf0]  ;;  %v1057_v47 = vor.u32 %v1127_v41, %v1056_v39  ;;  %v997_v48 = vor.u32 %v1110_v42, %v994_v43  ;;  %v984_v49 = vld [vmem:[%s1440_s10 + $0x30] sm:$0xf] }
  0x41   : > { %568 = vmatpush.bf16.msra.mxu0 %v1001_v31  ;;  %v1109_v50 = vld [vmem:[%s1440_s10 + $0x34] sm:$0xf0]  ;;  %v1048_v51 = vld [vmem:[%s1440_s10 + $0xb0] sm:$0xf]  ;;  %v1061_v52 = vor.u32 %v1126_v44, %v1058_v45  ;;  %v1108_v54 = vld [vmem:[%s1440_s10 + $0x34] sm:$0xf]  ;;  %v659_v45 = vlaneseq }
  0x42   : > { %582 = vmatpush.bf16.msra.mxu1 %v1065_v35  ;;  %596 = vmatpush.bf16.msra.mxu2 %v1005_v36  ;;  %v1125_v53 = vld [vmem:[%s1440_s10 + $0xb4] sm:$0xf0]  ;;  %v986_v55 = vld [vmem:[%s1440_s10 + $0x38] sm:$0xf0]  ;;  %v1124_v56 = vld [vmem:[%s1440_s10 + $0xb4] sm:$0xf]  ;;  %v985_v58 = vor.u32 %v1109_v50, %v984_v49 }
  0x43   : > { %610 = vmatpush.bf16.msra.mxu3 %v1069_v40  ;;  %v1050_v57 = vld [vmem:[%s1440_s10 + $0xb8] sm:$0xf0]  ;;  %v1049_v59 = vor.u32 %v1125_v53, %v1048_v51  ;;  %v989_v60 = vor.u32 %v1108_v54, %v986_v55  ;;  %v976_v61 = vld [vmem:[%s1440_s10 + $0x20] sm:$0xf]  ;;  %v1107_v62 = vld [vmem:[%s1440_s10 + $0x24] sm:$0xf0] }
  0x44   : > { %v1040_v63 = vld [vmem:[%s1440_s10 + $0xa0] sm:$0xf]  ;;  %v1053_v0 = vor.u32 %v1124_v56, %v1050_v57  ;;  %v1123_v1 = vld [vmem:[%s1440_s10 + $0xa4] sm:$0xf0]  ;;  %v1106_v2 = vld [vmem:[%s1440_s10 + $0x24] sm:$0xf]  ;;  %v977_v6 = vor.u32 %v1107_v62, %v976_v61 }
  0x45   : > { %569 = vmatpush.bf16.msra.mxu0 %v993_v46  ;;  %v978_v3 = vld [vmem:[%s1440_s10 + $0x28] sm:$0xf0]  ;;  %v1122_v4 = vld [vmem:[%s1440_s10 + $0xa4] sm:$0xf]  ;;  %v1041_v7 = vor.u32 %v1123_v1, %v1040_v63  ;;  %v968_v9 = vld [vmem:[%s1440_s10 + $0x10] sm:$0xf] }
  0x46   : > { %583 = vmatpush.bf16.msra.mxu1 %v1057_v47  ;;  %597 = vmatpush.bf16.msra.mxu2 %v997_v48  ;;  %v1042_v5 = vld [vmem:[%s1440_s10 + $0xa8] sm:$0xf0]  ;;  %v981_v8 = vor.u32 %v1106_v2, %v978_v3  ;;  %v1105_v10 = vld [vmem:[%s1440_s10 + $0x14] sm:$0xf0]  ;;  %v1032_v11 = vld [vmem:[%s1440_s10 + $0x90] sm:$0xf] }
  0x47   : > { %611 = vmatpush.bf16.msra.mxu3 %v1061_v52  ;;  %v1045_v12 = vor.u32 %v1122_v4, %v1042_v5  ;;  %v1121_v13 = vld [vmem:[%s1440_s10 + $0x94] sm:$0xf0]  ;;  %v1104_v14 = vld [vmem:[%s1440_s10 + $0x14] sm:$0xf]  ;;  %v970_v15 = vld [vmem:[%s1440_s10 + $0x18] sm:$0xf0]  ;;  %v969_v19 = vor.u32 %v1105_v10, %v968_v9 }
  0x48   : > { %v1120_v16 = vld [vmem:[%s1440_s10 + $0x94] sm:$0xf]  ;;  %v1034_v17 = vld [vmem:[%s1440_s10 + $0x98] sm:$0xf0]  ;;  %v622_v18 = vld [vmem:[%s1458_s9] sm:$0xff]  ;;  %v1333_v21 = vmov 0   ;;  %v1033_v22 = vor.u32 %v1121_v13, %v1032_v11  ;;  %v973_v23 = vor.u32 %v1104_v14, %v970_v15 }
  0x49   : > { %570 = vmatpush.bf16.msra.mxu0 %v985_v58  ;;  %v960_v20 = vld [vmem:[%s1440_s10] sm:$0xf]  ;;  %1212 = vset.pattern.permute.xlu0 %v1333_v21  ;;  %v1103_v24 = vld [vmem:[%s1440_s10 + $0x4] sm:$0xf0]  ;;  %v1037_v27 = vor.u32 %v1120_v16, %v1034_v17  ;;  %v1102_v29 = vld [vmem:[%s1440_s10 + $0x4] sm:$0xf] }
  0x4a   : > { %584 = vmatpush.bf16.msra.mxu1 %v1049_v59  ;;  %598 = vmatpush.bf16.msra.mxu2 %v989_v60  ;;  %v1024_v25 = vld [vmem:[%s1440_s10 + $0x80] sm:$0xf]  ;;  %v1119_v28 = vld [vmem:[%s1440_s10 + $0x84] sm:$0xf0]  ;;  %v962_v30 = vld [vmem:[%s1440_s10 + $0x8] sm:$0xf0]  ;;  %v961_v33 = vor.u32 %v1103_v24, %v960_v20 }
  0x4b   : > { %612 = vmatpush.bf16.msra.mxu3 %v1053_v0  ;;  %v656_v26 = vld [vmem:[%s1467_s13] sm:$0xff]  ;;  %627 = vperm.xlu0 %1212, %v622_v18   ;;  %v1026_v32 = vld [vmem:[%s1440_s10 + $0x88] sm:$0xf0]  ;;  %v1101_v35 = vld [vmem:[%s1453_s17 + $0x4] sm:$0xf0]  ;;  %v1025_v36 = vor.u32 %v1119_v28, %v1024_v25  ;;  %v965_v37 = vor.u32 %v1102_v29, %v962_v30  ;;  %s1090_s1 = sshll.u32 %s1310_s21, 8 }
  0x4c   : > { %v1118_v31 = vld [vmem:[%s1440_s10 + $0x84] sm:$0xf]  ;;  %1213 = vset.pattern.permute.xlu1 %v1333_v21  ;;  %v952_v34 = vld [vmem:[%s1453_s17] sm:$0xf]  ;;  %v954_v39 = vld [vmem:[%s1453_s17 + $0x8] sm:$0xf0]  ;;  %v662_v48 = vstv %s1090_s1 }
  0x4d   : > { %571 = vmatpush.bf16.msra.mxu0 %v977_v6  ;;  %666 = vperm.xlu1 %1213, %v656_v26   ;;  %v1100_v38 = vld [vmem:[%s1453_s17 + $0x4] sm:$0xf]  ;;  %v1029_v40 = vor.u32 %v1118_v31, %v1026_v32  ;;  %v953_v41 = vor.u32 %v1101_v35, %v952_v34  ;;  %v623_v42 = vld [vmem:[%s1458_s9 + $0x8] sm:$0xff]  ;;  %v660_v46 = vand.u32 127, %v659_v45  ;;  %v624_v47 = vld [vmem:[%s335_s30] sm:$0x3] }
  0x4e   : > { %585 = vmatpush.bf16.msra.mxu1 %v1041_v7  ;;  %599 = vmatpush.bf16.msra.mxu2 %v981_v8  ;;  %v957_v43 = vor.u32 %v1100_v38, %v954_v39  ;;  %v657_v44 = vld [vmem:[%s1467_s13 + $0x8] sm:$0xff]  ;;  %v636_v49 = vperm.slane %v624_v47, 0  ;;  %v637_v59 = vperm.slane %v624_v47, 1  ;;  %v1334_v60 = vmov 0.0   ;;  %p1095_p3 = scmp.ne.s32.totalorder %s1310_s21, 1 }
  0x4f   : > { %613 = vmatpush.bf16.msra.mxu3 %v1045_v12  ;;  %v663_v51 = vadd.s32 %v662_v48, %v660_v46  ;;  %v661_v52 = vadd.s32 128, %v660_v46  ;;  %vm745_vm5 = vcmask 7168   ;;  %v696_v47 = vld [vmem:[#allocation2 + $0x8] sm:$0xff] }
  0x51   : > { %572 = vmatpush.bf16.msra.mxu0 %v969_v19  ;;  %v664_v56 = vadd.s32 %v662_v48, %v661_v52 }
  0x52   : > { %586 = vmatpush.bf16.msra.mxu1 %v1033_v22  ;;  %600 = vmatpush.bf16.msra.mxu2 %v973_v23 }
  0x53   : > { %614 = vmatpush.bf16.msra.mxu3 %v1037_v27  ;;  %632 = vperm.xlu0 %1212, %v623_v42  }
  0x55   : > { %573 = vmatpush.bf16.msra.mxu0 %v961_v33  ;;  %669 = vperm.xlu1 %1213, %v657_v44  }
  0x56   : > { %587 = vmatpush.bf16.msra.mxu1 %v1025_v36  ;;  %601 = vmatpush.bf16.msra.mxu2 %v965_v37 }
  0x57   : > { %615 = vmatpush.bf16.msra.mxu3 %v1029_v40 }
  0x58   : > { %574 = vmatmul.bf16.vlgmr.msra.gmra.mxu0 %v953_v41 }
  0x59   : > { %588 = vmatmul.bf16.vlgmr.msra.gmra.mxu1 %v957_v43  ;;  %602 = vmatmul.bf16.vlgmr.msra.gmra.mxu2 %v953_v41 }
  0x5a   : > { %616 = vmatmul.bf16.vlgmr.msra.gmra.mxu3 %v957_v43  ;;  %v695_v43 = vld [vmem:[#allocation2] sm:$0xff] }
  0xbd   : > { %v628_v50 = vpop.permute.xlu0 %627 }
  0xbe   : > { %v640_v54 = vmul.f32 %v636_v49, %v628_v50  ;;  %v641_v2 = vmul.f32 %v637_v59, %v628_v50 }
  0xbf   : > { %v667_v53 = vpop.permute.xlu1 %666 }
  0xc0   : > { %vm671_vm1 = vcmp.eq.s32.totalorder %v663_v51, %v667_v53  ;;  %vm672_vm2 = vcmp.eq.s32.totalorder %v664_v56, %v667_v53 }
  0xc1   : > { %v1091_v61 = vsel %vm671_vm1, 1.0, %v1334_v60  ;;  %v1092_v5 = vsel %vm672_vm2, 1.0, %v1334_v60 }
  0xc2   : > { %v683_v63 = vmul.f32 0.35, %v1091_v61  ;;  %v684_v13 = vmul.f32 0.35, %v1092_v5 }
  0xc5   : > { %v633_v1 = vpop.permute.xlu0 %632 }
  0xc6   : > { %v642_v11 = vmul.f32 %v636_v49, %v633_v1  ;;  %v643_v23 = vmul.f32 %v637_v59, %v633_v1 }
  0xc7   : > { %v670_v4 = vpop.permute.xlu1 %669 }
  0xc8   : > { %vm673_vm3 = vcmp.eq.s32.totalorder %v663_v51, %v670_v4  ;;  %vm674_vm4 = vcmp.eq.s32.totalorder %v664_v56, %v670_v4 }
  0xc9   : > { %v1093_v18 = vsel %vm673_vm3, 1.0, %v1334_v60  ;;  %v1094_v27 = vsel %vm674_vm4, 1.0, %v1334_v60 }
  0xca   : > { %v685_v25 = vmul.f32 0.35, %v1093_v18  ;;  %v686_v33 = vmul.f32 0.35, %v1094_v27 }
  0xd5   : > { %v575_v55 = vpop.f32.mrf.mxu0 }
  0xd6   : > { %v589_v57 = vpop.f32.mrf.mxu1 }
  0xd7   : > { %v590_v58 = vadd.f32 %v589_v57, %v575_v55 }
  0xd9   : > { %v644_v62 = vmul.f32 %v640_v54, %v590_v58 }
  0xdb   : > { %v1086_v0 = vclamps-f32 %v644_v62, 1.0 }
  0xdc   : > { %v603_v3 = vpop.f32.mrf.mxu2 }
  0xdd   : > { %v617_v6 = vpop.f32.mrf.mxu3  ;;  %v577_v7 = vpop.f32.mrf.mxu0  ;;  %v687_v10 = vsub.f32 %v1086_v0, %v683_v63 }
  0xde   : > { %v618_v8 = vadd.f32 %v617_v6, %v603_v3  ;;  %v591_v9 = vpop.f32.mrf.mxu1 }
  0xdf   : > { %v592_v12 = vadd.f32 %v591_v9, %v577_v7  ;;  %v691_v17 = vmul.f32 30.0, %v687_v10 }
  0xe0   : > { %v645_v14 = vmul.f32 %v641_v2, %v618_v8 }
  0xe1   : > { %v646_v15 = vmul.f32 %v642_v11, %v592_v12  ;;  %v764_v28 = vmul.f32 %v1091_v61, %v691_v17  ;;  %v705_v11 = vld [vmem:[#allocation3] sm:$0xff] }
  0xe2   : > { %v1087_v16 = vclamps-f32 %v645_v14, 1.0 }
  0xe3   : > { %v1088_v20 = vclamps-f32 %v646_v15, 1.0 }
  0xe4   : > { %v688_v19 = vsub.f32 %v1087_v16, %v684_v13  ;;  %v605_v21 = vpop.f32.mrf.mxu2  ;;  %v706_v16 = vld [vmem:[#allocation3 + $0x8] sm:$0xff] }
  0xe5   : > { %v619_v22 = vpop.f32.mrf.mxu3  ;;  %v689_v29 = vsub.f32 %v1088_v20, %v685_v25 }
  0xe6   : > { %v692_v24 = vmul.f32 30.0, %v688_v19  ;;  %v620_v26 = vadd.f32 %v619_v22, %v605_v21 }
  0xe7   : > { %v693_v36 = vmul.f32 30.0, %v689_v29 }
  0xe8   : > { %v647_v30 = vmul.f32 %v643_v23, %v620_v26  ;;  %v697_v31 = vmax.f32 %v691_v17, %v692_v24  ;;  %v765_v32 = vmul.f32 %v1092_v5, %v692_v24  ;;  %v752_v51 = vadd.f32 %v692_v24, %v691_v17  ;;  %v750_v5 = vld [vmem:[#allocation4] sm:$0xff]  ;;  %v762_v23 = vld [vmem:[#allocation5] sm:$0xff]  ;;  %v763_v26 = vld [vmem:[#allocation5 + $0x8] sm:$0xff] }
  0xe9   : > { %v766_v40 = vmul.f32 %v1093_v18, %v693_v36 }
  0xea   : > { %v1089_v34 = vclamps-f32 %v647_v30, 1.0  ;;  %698 = vmax.xlane.f32.xlu2 %v697_v31  ;;  %v768_v35 = vadd.f32 %v765_v32, %v764_v28 }
  0xec   : > { %v690_v37 = vsub.f32 %v1089_v34, %v686_v33 }
  0xee   : > { %v694_v38 = vmul.f32 30.0, %v690_v37 }
  0xf0   : > { %v700_v39 = vmax.f32 %v693_v36, %v694_v38  ;;  %v767_v41 = vmul.f32 %v1094_v27, %v694_v38  ;;  %v755_v3 = vadd.f32 %v694_v38, %v693_v36 }
  0xf2   : > { %701 = vmax.xlane.f32.xlu2 %v700_v39  ;;  %v771_v42 = vadd.f32 %v767_v41, %v766_v40 }
 0x15d   : > { %v699_v44 = vpop.xlane.xlu2 %698 }
 0x15e   : > { %v703_v45 = vmax.f32 %v695_v43, %v699_v44 }
 0x160   : > { %v707_v46 = vsub.f32 %v695_v43, %v703_v45  ;;  %748 = vst.msk [vmem:[#allocation2] sm:$0xff] %vm745_vm5, %v703_v45  ;;  %717 = vperm.xlu0 %1212, %v703_v45  }
 0x162   : > { %v709_v8 = vmul.f32 1.442695, %v707_v46 }
 0x165   : > { %v702_v48 = vpop.xlane.xlu2 %701 }
 0x166   : > { %v704_v49 = vmax.f32 %v696_v47, %v702_v48 }
 0x168   : > { %v708_v50 = vsub.f32 %v696_v47, %v704_v49  ;;  %749 = vst.msk [vmem:[#allocation2 + $0x8] sm:$0xff] %vm745_vm5, %v704_v49  ;;  %722 = vperm.xlu1 %1213, %v704_v49  }
 0x16a   : > { %v711_v9 = vmul.f32 1.442695, %v708_v50 }
 0x192   : > { %753 = vadd.xlane.f32.xlu1 %v752_v51 }
 0x1d2   : > { %v718_v52 = vpop.permute.xlu0 %717 }
 0x1d3   : > { %v725_v53 = vsub.f32 %v691_v17, %v718_v52  ;;  %v726_v54 = vsub.f32 %v692_v24, %v718_v52  ;;  %v751_v17 = vld [vmem:[#allocation4 + $0x8] sm:$0xff] }
 0x1d5   : > { %v729_v55 = vmul.f32 1.442695, %v725_v53  ;;  %v731_v56 = vmul.f32 1.442695, %v726_v54 }
 0x1d7   : > { %1214 = vpow2.f32 %v729_v55 }
 0x1d8   : > { %1216 = vpow2.f32 %v731_v56 }
 0x1da   : > { %v723_v57 = vpop.permute.xlu1 %722 }
 0x1db   : > { %v727_v58 = vsub.f32 %v693_v36, %v723_v57  ;;  %v728_v59 = vsub.f32 %v694_v38, %v723_v57 }
 0x1dd   : > { %v1215_v60 = vpop.eup %1214  ;;  %v733_v61 = vmul.f32 1.442695, %v727_v58  ;;  %v735_v62 = vmul.f32 1.442695, %v728_v59 }
 0x1de   : > { %v1217_v63 = vpop.eup %1216 }
 0x1df   : > { %1218 = vpow2.f32 %v733_v61  ;;  %v737_v0 = vadd.f32 %v1217_v63, %v1215_v60 }
 0x1e0   : > { %1220 = vpow2.f32 %v735_v62 }
 0x1e1   : > { %738 = vadd.xlane.f32.xlu2 %v737_v0  ;;  %1222 = vpow2.f32 %v709_v8 }
 0x1e2   : > { %1224 = vpow2.f32 %v711_v9 }
 0x1e5   : > { %v1219_v1 = vpop.eup %1218 }
 0x1e6   : > { %v1221_v2 = vpop.eup %1220 }
 0x1e7   : > { %v740_v4 = vadd.f32 %v1221_v2, %v1219_v1  ;;  %v1223_v10 = vpop.eup %1222 }
 0x1e8   : > { %v713_v12 = vmul.f32 %v1223_v10, %v705_v11  ;;  %v1225_v15 = vpop.eup %1224 }
 0x1e9   : > { %756 = vadd.xlane.f32.xlu2 %v755_v3  ;;  %741 = vadd.xlane.f32.xlu0 %v740_v4  ;;  %v714_v18 = vmul.f32 %v1225_v15, %v706_v16 }
 0x1f1   : > { %769 = vadd.xlane.f32.xlu2 %v768_v35 }
 0x1f9   : > { %772 = vadd.xlane.f32.xlu2 %v771_v42 }
 0x205   : > { %v754_v6 = vpop.xlane.xlu1 %753 }
 0x206   : > { %v758_v7 = vadd.f32 %v754_v6, %v750_v5 }
 0x208   : > { %760 = vst.msk [vmem:[#allocation4] sm:$0xff] %vm745_vm5, %v758_v7 }
 0x254   : > { %v739_v13 = vpop.xlane.xlu2 %738 }
 0x255   : > { %v743_v14 = vadd.f32 %v739_v13, %v713_v12 }
 0x257   : > { %746 = vst.msk [vmem:[#allocation3] sm:$0xff] %vm745_vm5, %v743_v14 }
 0x25c   : > { %v742_v19 = vpop.xlane.xlu0 %741  ;;  %v757_v20 = vpop.xlane.xlu2 %756 }
 0x25d   : > { %v744_v21 = vadd.f32 %v742_v19, %v714_v18  ;;  %v759_v22 = vadd.f32 %v757_v20, %v751_v17 }
 0x25f   : > { %747 = vst.msk [vmem:[#allocation3 + $0x8] sm:$0xff] %vm745_vm5, %v744_v21 }
 0x260   : > { %761 = vst.msk [vmem:[#allocation4 + $0x8] sm:$0xff] %vm745_vm5, %v759_v22 }
 0x264   : > { %v770_v24 = vpop.xlane.xlu2 %769 }
 0x265   : > { %v774_v25 = vadd.f32 %v770_v24, %v762_v23 }
 0x267   : > { %776 = vst.msk [vmem:[#allocation5] sm:$0xff] %vm745_vm5, %v774_v25 }
 0x26b   : > { %781 = sbr.rel (%p1095_p3) target bundleno = 642 (0x282), region = 52 }
 0x26c   : > { %v773_v27 = vpop.xlane.xlu2 %772 }
 0x26d   : > { %v775_v28 = vadd.f32 %v773_v27, %v763_v26 }
 0x26f   : > { %777 = vst.msk [vmem:[#allocation5 + $0x8] sm:$0xff] %vm745_vm5, %v775_v28 }
 0x270   : > { %v784_v29 = vld [vmem:[#allocation3] sm:$0xff]  ;;  %v785_v30 = vld [vmem:[#allocation3 + $0x8] sm:$0xff]  ;;  %v782_v34 = vld [vmem:[#allocation2] sm:$0xff] }
 0x271   : > { %1226 = vlog2.f32 %v784_v29  ;;  %v792_v31 = vld [vmem:[#allocation5] sm:$0xff]  ;;  %v798_v35 = vld [vmem:[#allocation4] sm:$0xff]  ;;  %v783_v39 = vld [vmem:[#allocation2 + $0x8] sm:$0xff] }
 0x272   : > { %1228 = vlog2.f32 %v785_v30  ;;  %v794_v38 = vmul.f32 0.9, %v792_v31  ;;  %v799_v40 = vld [vmem:[#allocation4 + $0x8] sm:$0xff]  ;;  %v800_v44 = vmul.f32 0.0001953125, %v798_v35 }
 0x273   : > { %v801_v46 = vmul.f32 0.0001953125, %v799_v40 }
 0x276   : > { %v793_v32 = vld [vmem:[#allocation5 + $0x8] sm:$0xff] }
 0x277   : > { %v1227_v33 = vpop.eup %1226  ;;  %v795_v42 = vmul.f32 0.9, %v793_v32 }
 0x278   : > { %v1229_v36 = vpop.eup %1228  ;;  %v787_v37 = vmul.f32 0.6931472, %v1227_v33 }
 0x279   : > { %v789_v41 = vmul.f32 0.6931472, %v1229_v36 }
 0x27a   : > { %v790_v43 = vadd.f32 %v787_v37, %v782_v34 }
 0x27b   : > { %v791_v45 = vadd.f32 %v789_v41, %v783_v39 }
 0x27c   : > { %v796_v47 = vsub.f32 %v790_v43, %v794_v38 }
 0x27d   : > { %v797_v48 = vsub.f32 %v791_v45, %v795_v42 }
 0x27e   : > { %v802_v49 = vsub.f32 %v796_v47, %v800_v44 }
 0x27f   : > { %v803_v50 = vsub.f32 %v797_v48, %v801_v46 }
 0x280   : > { %804 = vst.msk [vmem:[%s1472_s15] sm:$0xff] %vm745_vm5, %v802_v49 }
 0x281   : > { %805 = vst.msk [vmem:[%s1472_s15 + $0x8] sm:$0xff] %vm745_vm5, %v803_v50 }
 0x282 PF: > { %s18_s25 = sadd.s32 1, %s1326_s25   ;;  %s1600_s18 = smov %s1302_s19 }
 0x283   : > { %p15_p4 = scmp.ge.s32.totalorder %s18_s25, 6   ;;  %s1601_s19 = smov %s1306_s20 }
 0x284   : > { %s1602_s20 = smov %s1423_s7  ;;  %s1603_s21 = smov %s1318_s23 }
 0x285   : > { %s1604_s22 = smov %s1322_s24  ;;  %s1605_s23 = smov %s1608_s27 }
 0x286   : > { %s1606_s24 = smov %s1612_s28  ;;  %17 = sbr.rel (!%p15_p4) target bundleno = 7 (0x7), region = 100 }
 0x28b   :  { %828 = vsyncpa [#allocation7], 1 }
 0x28c   :  { %830 = vsyncpa [#allocation7 + $0x1], 1 }

</bundles_post_ra>
